<compile_context>
chip_gen: v6e
topology: v6e:2x2x1
jax: 0.10.0
libtpu: 0.0.40
codegen_flags: <defaults>
</compile_context>

<pallas_src>
import math

import jax
import jax.numpy as jnp
from jax import lax
from jax.experimental import pallas as pl
from jax.experimental.pallas import tpu as pltpu


def _round_up(x, m):
    return ((x + m - 1) // m) * m


def _nbytes(shape, dtype):
    return math.prod(shape) * jnp.dtype(dtype).itemsize


def _softplus(x):
    # numerically stable softplus (same math as torch.log1p(torch.exp(x)))
    return jnp.maximum(x, 0.0) + jnp.log1p(jnp.exp(-jnp.abs(x)))


# ----------------------------- Pallas kernels ------------------------------


def _train_kernel(x_ref, a_ref, b_ref, c_ref, z_ref, bmu_ref, bvar_ref,
                  eps_ref, out_ref, acc_e, acc_v):
    """Training / sample=True branch (local reparameterization).

    Uses precomputed derived planes:
      A = weight_mu * alpha, B = alpha * sigma_w^2, C = alpha*(1-alpha)*mu^2
      e_w   = A * z
      var_w = B + C * z^2
      out   = (x @ e_w.T + bias_mu) + sqrt(x^2 @ var_w.T + bias_sigma^2) * eps
    """
    k = pl.program_id(2)

    @pl.when(k == 0)
    def _():
        acc_e[...] = jnp.zeros_like(acc_e)
        acc_v[...] = jnp.zeros_like(acc_v)

    z = z_ref[...]                                       # [1, TK] f32
    zb = z.astype(jnp.bfloat16)
    zz = (z * z).astype(jnp.bfloat16)                    # [1, TK] bf16

    e_w = a_ref[...] * zb                                # [TN, TK] bf16
    var_w = b_ref[...] + c_ref[...] * zz                 # [TN, TK] bf16 (>= 0)

    x = x_ref[...]                                       # [TB, TK] bf16
    xf = x.astype(jnp.float32)
    x2 = (xf * xf).astype(jnp.bfloat16)

    dn = (((1,), (1,)), ((), ()))                        # contract on IN
    acc_e[...] += lax.dot_general(x, e_w, dn,
                                  preferred_element_type=jnp.float32)
    acc_v[...] += lax.dot_general(x2, var_w, dn,
                                  preferred_element_type=jnp.float32)

    @pl.when(k == pl.num_programs(2) - 1)
    def _():
        e_b = acc_e[...] + bmu_ref[...]                  # [TB, TN] + [1, TN]
        var_b = acc_v[...] + bvar_ref[...]
        out_ref[...] = (e_b + jnp.sqrt(var_b) * eps_ref[...]).astype(out_ref.dtype)


def _eval_kernel(x_ref, wmu_ref, wsig_ref, epsw_ref, z_ref, bias_ref,
                 out_ref, acc):
    """Eval branch (training=False, sample=False).

    Pre-gated / pre-activated planes: wmu_g = mu*gate, wsig_g = softplus(rho)*gate
      weight = wmu_g * z + wsig_g * eps_w
      out    = x @ weight.T + (bias_mu + bias_sigma * eps_b)
    """
    k = pl.program_id(2)

    @pl.when(k == 0)
    def _():
        acc[...] = jnp.zeros_like(acc)

    zb = z_ref[...].astype(jnp.bfloat16)                 # [1, TK]
    w = wmu_ref[...] * zb + wsig_ref[...] * epsw_ref[...]  # [TN, TK] bf16

    dn = (((1,), (1,)), ((), ()))
    acc[...] += lax.dot_general(x_ref[...], w, dn,
                                preferred_element_type=jnp.float32)

    @pl.when(k == pl.num_programs(2) - 1)
    def _():
        out_ref[...] = (acc[...] + bias_ref[...]).astype(out_ref.dtype)


# ----------------------------- Python wrapper -------------------------------


class BayesianLinearPallas:
    """Deterministically-initialized JAX/Pallas port of BayesianLinear."""

    def __init__(self, in_features, out_features, num_transforms, key,
                 param_dtype=jnp.bfloat16,
                 block_b=512, block_out=512, block_in=1024):
        k = jax.random.split(key, 7)
        self.in_features = in_features
        self.out_features = out_features
        self.num_transforms = num_transforms
        self.param_dtype = param_dtype
        self.tb_cap = block_b

        # Lane-dense tiles (multiples of 128) clamped for small layers.
        self.tn = min(block_out, _round_up(out_features, 128))
        self.tk = min(block_in, _round_up(in_features, 128))
        self.out_pad = _round_up(out_features, self.tn)
        self.in_pad = _round_up(in_features, self.tk)
        # Keep >= 2 OUT tiles when possible so the parallel j axis can be
        # sharded across both v7x TensorCores.
        if self.out_pad // self.tn == 1 and self.out_pad % 256 == 0:
            self.tn = self.out_pad // 2

        # ----- raw parameters (f32, kept for reference math / KL terms) -----
        wmu = jax.random.uniform(k[0], (out_features, in_features),
                                 jnp.float32, -0.01, 0.01)
        wrho = -9.0 + 0.1 * jax.random.normal(
            k[1], (out_features, in_features), jnp.float32)
        lam = jax.random.uniform(k[2], (out_features, in_features),
                                 jnp.float32, -15.0, 10.0)
        bmu = jax.random.uniform(k[3], (out_features,), jnp.float32, -0.2, 0.2)
        brho = -9.0 + jax.random.normal(k[4], (out_features,), jnp.float32)
        self.weight_mu, self.weight_rho, self.lambdal = wmu, wrho, lam
        self.bias_mu, self.bias_rho = bmu, brho

        self.q0_mean = jax.random.normal(k[5], (in_features,), jnp.float32)
        self.q0_log_var = -9.0 + jax.random.normal(k[6], (in_features,),
                                                   jnp.float32)
        # TODO(synk): PropagateFlow / IAF internals are not defined in the
        # reference file; z_flow is treated as the identity flow (log_det = 0).

        # ----- derived, streamed planes (computed once in f32, stored bf16) --
        alpha = jax.nn.sigmoid(lam)
        wsig = _softplus(wrho)
        gate = (lam > 0.0).astype(jnp.float32)           # == sigmoid(lam) > 0.5

        def pad2(a):
            return jnp.pad(a, ((0, self.out_pad - out_features),
                               (0, self.in_pad - in_features)))

        # Training planes: e_w = A*z, var_w = B + C*z^2.
        self.plane_a = pad2(wmu * alpha).astype(param_dtype)
        self.plane_b = pad2(alpha * wsig * wsig).astype(param_dtype)
        self.plane_c = pad2(alpha * (1.0 - alpha) * wmu * wmu).astype(param_dtype)
        # Eval planes: pre-gated / pre-activated.
        self.wmu_g = pad2(wmu * gate).astype(param_dtype)
        self.wsig_g = pad2(wsig * gate).astype(param_dtype)

        bsig = _softplus(brho)
        self.bias_sigma = bsig
        self.bias_mu_p = jnp.pad(bmu, (0, self.out_pad - out_features))
        self.bias_var_p = jnp.pad(bsig * bsig, (0, self.out_pad - out_features))

    def sample_z(self, key):
        q0_std = jnp.sqrt(jnp.exp(self.q0_log_var))
        eps_z = jax.random.normal(key, q0_std.shape, jnp.float32)
        z = self.q0_mean + q0_std * eps_z
        zs, log_det_q = z, jnp.zeros((), jnp.float32)    # identity flow
        return zs, log_det_q

    def _vmem_limit(self, tb):
        # Double-buffered inputs/outputs + f32 accumulators + in-kernel f32
        # temporaries, capped at 80% of the generation's physical VMEM.
        tile_bytes = (
            2 * _nbytes((tb, self.tk), jnp.bfloat16)                  # x
            + 2 * 3 * _nbytes((self.tn, self.tk), self.param_dtype)   # planes
            + 2 * _nbytes((1, self.tk), jnp.float32)                  # z
            + 2 * 2 * _nbytes((1, self.tn), jnp.float32)              # biases
            + 2 * 2 * _nbytes((tb, self.tn), jnp.float32)             # eps + out
            + 2 * _nbytes((tb, self.tn), jnp.float32)                 # acc scratch
            + 4 * _nbytes((self.tn, self.tk), jnp.float32)            # f32 temps
            + 2 * _nbytes((tb, self.tk), jnp.float32))                # x upcast/sq
        try:
            info = pltpu.get_tpu_info()
            vmem_phys = int(getattr(info, "vmem_capacity_bytes", 64 << 20))
        except Exception:
            vmem_phys = 64 << 20                                      # v7x-safe
        cap = int(vmem_phys * 0.80)
        return int(min(cap, max(32 << 20, tile_bytes + (8 << 20))))

    def __call__(self, x, key, sample=False, training=True):
        batch = x.shape[0]
        assert x.shape[1] == self.in_features
        kz, ke, kw, kb = jax.random.split(key, 4)

        z_k, _ = self.sample_z(kz)
        z2 = jnp.pad(z_k, (0, self.in_pad - self.in_features)
                     ).reshape(1, self.in_pad).astype(jnp.float32)

        # Single batch tile up to tb_cap so weights stream exactly once/call.
        tb = min(self.tb_cap, _round_up(batch, 8))
        b_pad = _round_up(batch, tb)
        x_p = jnp.pad(x, ((0, b_pad - batch),
                          (0, self.in_pad - self.in_features))
                      ).astype(jnp.bfloat16)

        grid = (b_pad // tb, self.out_pad // self.tn, self.in_pad // self.tk)
        out_shape = jax.ShapeDtypeStruct((b_pad, self.out_pad), jnp.float32)

        x_m = lambda i, j, k: (i, k)
        w_m = lambda i, j, k: (j, k)
        z_m = lambda i, j, k: (0, k)
        b_m = lambda i, j, k: (0, j)
        o_m = lambda i, j, k: (i, j)

        compiler_params = pltpu.CompilerParams(
            dimension_semantics=("parallel", "parallel", "arbitrary"),
            vmem_limit_bytes=self._vmem_limit(tb))

        if training or sample:
            # TODO(synk): output noise eps could be generated on-chip with the
            # hardware PRNG to save a batch x out_pad HBM read, but
            # pltpu.prng_seed has no interpret/CPU lowering, so it is drawn
            # host-side with jax.random and streamed.
            eps = jax.random.normal(ke, (batch, self.out_features), jnp.float32)
            eps_p = jnp.pad(eps, ((0, b_pad - batch),
                                  (0, self.out_pad - self.out_features)))
            bmu2 = self.bias_mu_p.reshape(1, self.out_pad)
            bvar2 = self.bias_var_p.reshape(1, self.out_pad)
            out_p = pl.pallas_call(
                _train_kernel,
                out_shape=out_shape,
                grid_spec=pltpu.PrefetchScalarGridSpec(
                    num_scalar_prefetch=0,
                    grid=grid,
                    in_specs=[
                        pl.BlockSpec((tb, self.tk), x_m),
                        pl.BlockSpec((self.tn, self.tk), w_m),
                        pl.BlockSpec((self.tn, self.tk), w_m),
                        pl.BlockSpec((self.tn, self.tk), w_m),
                        pl.BlockSpec((1, self.tk), z_m),
                        pl.BlockSpec((1, self.tn), b_m),
                        pl.BlockSpec((1, self.tn), b_m),
                        pl.BlockSpec((tb, self.tn), o_m),
                    ],
                    out_specs=pl.BlockSpec((tb, self.tn), o_m),
                    scratch_shapes=[pltpu.VMEM((tb, self.tn), jnp.float32),
                                    pltpu.VMEM((tb, self.tn), jnp.float32)]),
                compiler_params=compiler_params,
            )(x_p, self.plane_a, self.plane_b, self.plane_c,
              z2, bmu2, bvar2, eps_p)
        else:
            # One sampled weight per call (same for all batch rows), drawn with
            # jax.random (reproducible) and streamed in bf16.
            eps_w = jax.random.normal(kw, (self.out_pad, self.in_pad),
                                      jnp.float32).astype(jnp.bfloat16)
            eps_b = jax.random.normal(kb, (self.out_features,), jnp.float32)
            b_sampled = self.bias_mu + self.bias_sigma * eps_b
            b2 = jnp.pad(b_sampled, (0, self.out_pad - self.out_features)
                         ).reshape(1, self.out_pad)
            out_p = pl.pallas_call(
                _eval_kernel,
                out_shape=out_shape,
                grid_spec=pltpu.PrefetchScalarGridSpec(
                    num_scalar_prefetch=0,
                    grid=grid,
                    in_specs=[
                        pl.BlockSpec((tb, self.tk), x_m),
                        pl.BlockSpec((self.tn, self.tk), w_m),
                        pl.BlockSpec((self.tn, self.tk), w_m),
                        pl.BlockSpec((self.tn, self.tk), w_m),
                        pl.BlockSpec((1, self.tk), z_m),
                        pl.BlockSpec((1, self.tn), b_m),
                    ],
                    out_specs=pl.BlockSpec((tb, self.tn), o_m),
                    scratch_shapes=[pltpu.VMEM((tb, self.tn), jnp.float32)]),
                compiler_params=compiler_params,
            )(x_p, self.wmu_g, self.wsig_g, eps_w, z2, b2)

        return out_p[:batch, :self.out_features]


# --------------------------------- main -------------------------------------

if __name__ == "__main__":
    key = jax.random.PRNGKey(0)
    k_params, k_x, k_fwd1, k_fwd2 = jax.random.split(key, 4)

    # Small demo shapes; block_in/block_out shrunk so the demo still exercises
    # a multi-step (i, j, k) grid with accumulation and padding.
    batch, in_features, out_features = 8, 300, 200
    layer = BayesianLinearPallas(in_features, out_features, num_transforms=2,
                                 key=k_params, block_in=128, block_out=128)

    x = jax.random.normal(k_x, (batch, in_features), jnp.float32)

    # ---- training / sample=True branch -------------------------------------
    out_train = jax.block_until_ready(layer(x, k_fwd1, sample=True, training=True))
    assert out_train.shape == (batch, out_features)
    assert bool(jnp.all(jnp.isfinite(out_train)))

    # Pure-JAX f32 reference with identical z / eps draws, built from the same
    # bf16-stored derived planes (checks tiling/accumulation of the kernel).
    kz, ke, _, _ = jax.random.split(k_fwd1, 4)
    z_ref, _ = layer.sample_z(kz)
    eps_ref = jax.random.normal(ke, (batch, out_features), jnp.float32)
    A = layer.plane_a[:out_features, :in_features].astype(jnp.float32)
    B = layer.plane_b[:out_features, :in_features].astype(jnp.float32)
    C = layer.plane_c[:out_features, :in_features].astype(jnp.float32)
    e_w = A * z_ref
    var_w = B + C * z_ref ** 2
    e_b = x @ e_w.T + layer.bias_mu
    var_b = (x ** 2) @ var_w.T + _softplus(layer.bias_rho) ** 2
    ref_train = e_b + jnp.sqrt(var_b) * eps_ref
    max_err = float(jnp.max(jnp.abs(out_train - ref_train)))
    assert bool(jnp.allclose(out_train, ref_train, rtol=2e-2, atol=1e-2)), max_err

    # ---- eval branch (training=False, sample=False) -------------------------
    out_eval = jax.block_until_ready(layer(x, k_fwd2, sample=False, training=False))
    assert out_eval.shape == (batch, out_features)
    assert bool(jnp.all(jnp.isfinite(out_eval)))

    # weight_sigma = softplus(~-9) is tiny, so the eval output must be tightly
    # concentrated around x @ (weight_mu * z * gate).T + bias_mu.
    kz2, _, _, _ = jax.random.split(k_fwd2, 4)
    z_eval, _ = layer.sample_z(kz2)
    gate = (layer.lambdal > 0.0).astype(jnp.float32)
    mean_eval = x @ (layer.weight_mu * z_eval * gate).T + layer.bias_mu
    assert float(jnp.max(jnp.abs(out_eval - mean_eval))) < 0.1

    print("KERNEL_OK")
</pallas_src>

<mosaic_0001>
module attributes {stable_mosaic.version = 11 : i64} {
  func.func @_train_kernel(%arg0: i32, %arg1: i32, %arg2: i32, %arg3: memref<8x128xbf16, #tpu.memory_space<vmem>>, %arg4: memref<128x128xbf16, #tpu.memory_space<vmem>>, %arg5: memref<128x128xbf16, #tpu.memory_space<vmem>>, %arg6: memref<128x128xbf16, #tpu.memory_space<vmem>>, %arg7: memref<1x128xf32, #tpu.memory_space<vmem>>, %arg8: memref<1x128xf32, #tpu.memory_space<vmem>>, %arg9: memref<1x128xf32, #tpu.memory_space<vmem>>, %arg10: memref<8x128xf32, #tpu.memory_space<vmem>>, %arg11: memref<8x128xf32, #tpu.memory_space<vmem>>, %arg12: memref<8x128xf32, #tpu.memory_space<vmem>>, %arg13: memref<8x128xf32, #tpu.memory_space<vmem>>) attributes {dimension_semantics = [#tpu.dimension_semantics<parallel>, #tpu.dimension_semantics<parallel>, #tpu.dimension_semantics<arbitrary>], iteration_bounds = array<i64: 1, 2, 3>, scalar_prefetch = 0 : i64, scratch_operands = 2 : i64, tpu.core_type = #tpu.core_type<tc>, window_params = [{transform_indices = @transform_0, window_bounds = array<i64: 8, 128>}, {transform_indices = @transform_1, window_bounds = array<i64: 128, 128>}, {transform_indices = @transform_2, window_bounds = array<i64: 128, 128>}, {transform_indices = @transform_3, window_bounds = array<i64: 128, 128>}, {transform_indices = @transform_4, window_bounds = array<i64: 1, 128>}, {transform_indices = @transform_5, window_bounds = array<i64: 1, 128>}, {transform_indices = @transform_6, window_bounds = array<i64: 1, 128>}, {transform_indices = @transform_7, window_bounds = array<i64: 8, 128>}, {transform_indices = @transform_8, window_bounds = array<i64: 8, 128>}]} {
    %c0_i32 = arith.constant 0 : i32
    %0 = arith.cmpi eq, %arg2, %c0_i32 : i32
    %1 = arith.extui %0 : i1 to i32
    %c0_i32_0 = arith.constant 0 : i32
    %2 = arith.cmpi ne, %1, %c0_i32_0 : i32
    scf.if %2 {
      %cst_20 = arith.constant 0.000000e+00 : f32
      %30 = vector.broadcast %cst_20 : f32 to vector<8x128xf32>
      %c0_21 = arith.constant 0 : index
      %c0_22 = arith.constant 0 : index
      %31 = vector.load %arg12[%c0_21, %c0_22] : memref<8x128xf32, #tpu.memory_space<vmem>>, vector<8x128xf32>
      tpu.vector_store %arg12[%c0_21, %c0_22], %30 {strides = array<i32>} : memref<8x128xf32, #tpu.memory_space<vmem>>, vector<8x128xf32>,
      %cst_23 = arith.constant 0.000000e+00 : f32
      %32 = vector.broadcast %cst_23 : f32 to vector<8x128xf32>
      %c0_24 = arith.constant 0 : index
      %c0_25 = arith.constant 0 : index
      %33 = vector.load %arg13[%c0_24, %c0_25] : memref<8x128xf32, #tpu.memory_space<vmem>>, vector<8x128xf32>
      tpu.vector_store %arg13[%c0_24, %c0_25], %32 {strides = array<i32>} : memref<8x128xf32, #tpu.memory_space<vmem>>, vector<8x128xf32>,
    } else {
    }
    %c0 = arith.constant 0 : index
    %c0_1 = arith.constant 0 : index
    %3 = vector.load %arg7[%c0, %c0_1] : memref<1x128xf32, #tpu.memory_space<vmem>>, vector<1x128xf32>
    %4 = arith.truncf %3 : vector<1x128xf32> to vector<1x128xbf16>
    %5 = arith.mulf %3, %3 : vector<1x128xf32>
    %6 = arith.truncf %5 : vector<1x128xf32> to vector<1x128xbf16>
    %c0_2 = arith.constant 0 : index
    %c0_3 = arith.constant 0 : index
    %7 = vector.load %arg4[%c0_2, %c0_3] : memref<128x128xbf16, #tpu.memory_space<vmem>>, vector<128x128xbf16>
    %8 = vector.broadcast %4 : vector<1x128xbf16> to vector<128x128xbf16>
    %9 = arith.mulf %7, %8 : vector<128x128xbf16>
    %c0_4 = arith.constant 0 : index
    %c0_5 = arith.constant 0 : index
    %10 = vector.load %arg5[%c0_4, %c0_5] : memref<128x128xbf16, #tpu.memory_space<vmem>>, vector<128x128xbf16>
    %c0_6 = arith.constant 0 : index
    %c0_7 = arith.constant 0 : index
    %11 = vector.load %arg6[%c0_6, %c0_7] : memref<128x128xbf16, #tpu.memory_space<vmem>>, vector<128x128xbf16>
    %12 = vector.broadcast %6 : vector<1x128xbf16> to vector<128x128xbf16>
    %13 = arith.mulf %11, %12 : vector<128x128xbf16>
    %14 = arith.addf %10, %13 : vector<128x128xbf16>
    %c0_8 = arith.constant 0 : index
    %c0_9 = arith.constant 0 : index
    %15 = vector.load %arg3[%c0_8, %c0_9] : memref<8x128xbf16, #tpu.memory_space<vmem>>, vector<8x128xbf16>
    %16 = arith.extf %15 : vector<8x128xbf16> to vector<8x128xf32>
    %17 = arith.mulf %16, %16 : vector<8x128xf32>
    %18 = arith.truncf %17 : vector<8x128xf32> to vector<8x128xbf16>
    %c0_10 = arith.constant 0 : index
    %c0_11 = arith.constant 0 : index
    %19 = vector.load %arg12[%c0_10, %c0_11] : memref<8x128xf32, #tpu.memory_space<vmem>>, vector<8x128xf32>
    %cst = arith.constant dense<0.000000e+00> : vector<8x128xf32>
    %20 = tpu.matmul %15, %9, %cst {dimension_numbers = #tpu.dot_dimension_numbers<[1], [1], [0], [0], [0, 0, 1, 0], [], []>} : vector<8x128xbf16>, vector<128x128xbf16>, vector<8x128xf32> -> vector<8x128xf32>
    %21 = arith.addf %19, %20 : vector<8x128xf32>
    %c0_12 = arith.constant 0 : index
    %c0_13 = arith.constant 0 : index
    %22 = vector.load %arg12[%c0_12, %c0_13] : memref<8x128xf32, #tpu.memory_space<vmem>>, vector<8x128xf32>
    tpu.vector_store %arg12[%c0_12, %c0_13], %21 {strides = array<i32>} : memref<8x128xf32, #tpu.memory_space<vmem>>, vector<8x128xf32>,
    %c0_14 = arith.constant 0 : index
    %c0_15 = arith.constant 0 : index
    %23 = vector.load %arg13[%c0_14, %c0_15] : memref<8x128xf32, #tpu.memory_space<vmem>>, vector<8x128xf32>
    %cst_16 = arith.constant dense<0.000000e+00> : vector<8x128xf32>
    %24 = tpu.matmul %18, %14, %cst_16 {dimension_numbers = #tpu.dot_dimension_numbers<[1], [1], [0], [0], [0, 0, 1, 0], [], []>} : vector<8x128xbf16>, vector<128x128xbf16>, vector<8x128xf32> -> vector<8x128xf32>
    %25 = arith.addf %23, %24 : vector<8x128xf32>
    %c0_17 = arith.constant 0 : index
    %c0_18 = arith.constant 0 : index
    %26 = vector.load %arg13[%c0_17, %c0_18] : memref<8x128xf32, #tpu.memory_space<vmem>>, vector<8x128xf32>
    tpu.vector_store %arg13[%c0_17, %c0_18], %25 {strides = array<i32>} : memref<8x128xf32, #tpu.memory_space<vmem>>, vector<8x128xf32>,
    %c2_i32 = arith.constant 2 : i32
    %27 = arith.cmpi eq, %arg2, %c2_i32 : i32
    %28 = arith.extui %27 : i1 to i32
    %c0_i32_19 = arith.constant 0 : i32
    %29 = arith.cmpi ne, %28, %c0_i32_19 : i32
    scf.if %29 {
      %c0_20 = arith.constant 0 : index
      %c0_21 = arith.constant 0 : index
      %30 = vector.load %arg12[%c0_20, %c0_21] : memref<8x128xf32, #tpu.memory_space<vmem>>, vector<8x128xf32>
      %c0_22 = arith.constant 0 : index
      %c0_23 = arith.constant 0 : index
      %31 = vector.load %arg8[%c0_22, %c0_23] : memref<1x128xf32, #tpu.memory_space<vmem>>, vector<1x128xf32>
      %32 = vector.broadcast %31 : vector<1x128xf32> to vector<8x128xf32>
      %33 = arith.addf %30, %32 : vector<8x128xf32>
      %c0_24 = arith.constant 0 : index
      %c0_25 = arith.constant 0 : index
      %34 = vector.load %arg13[%c0_24, %c0_25] : memref<8x128xf32, #tpu.memory_space<vmem>>, vector<8x128xf32>
      %c0_26 = arith.constant 0 : index
      %c0_27 = arith.constant 0 : index
      %35 = vector.load %arg9[%c0_26, %c0_27] : memref<1x128xf32, #tpu.memory_space<vmem>>, vector<1x128xf32>
      %36 = vector.broadcast %35 : vector<1x128xf32> to vector<8x128xf32>
      %37 = arith.addf %34, %36 : vector<8x128xf32>
      %38 = math.sqrt %37 : vector<8x128xf32>
      %c0_28 = arith.constant 0 : index
      %c0_29 = arith.constant 0 : index
      %39 = vector.load %arg10[%c0_28, %c0_29] : memref<8x128xf32, #tpu.memory_space<vmem>>, vector<8x128xf32>
      %40 = arith.mulf %38, %39 : vector<8x128xf32>
      %41 = arith.addf %33, %40 : vector<8x128xf32>
      %c0_30 = arith.constant 0 : index
      %c0_31 = arith.constant 0 : index
      %42 = vector.load %arg11[%c0_30, %c0_31] : memref<8x128xf32, #tpu.memory_space<vmem>>, vector<8x128xf32>
      tpu.vector_store %arg11[%c0_30, %c0_31], %41 {strides = array<i32>} : memref<8x128xf32, #tpu.memory_space<vmem>>, vector<8x128xf32>,
    } else {
    }
    return
  }
  func.func @transform_0(%arg0: i32, %arg1: i32, %arg2: i32) -> (i32, i32) {
    %c0_i32 = arith.constant 0 : i32
    return %arg0, %arg2 : i32, i32
  }
  func.func @transform_1(%arg0: i32, %arg1: i32, %arg2: i32) -> (i32, i32) {
    %c0_i32 = arith.constant 0 : i32
    return %arg1, %arg2 : i32, i32
  }
  func.func @transform_2(%arg0: i32, %arg1: i32, %arg2: i32) -> (i32, i32) {
    %c0_i32 = arith.constant 0 : i32
    return %arg1, %arg2 : i32, i32
  }
  func.func @transform_3(%arg0: i32, %arg1: i32, %arg2: i32) -> (i32, i32) {
    %c0_i32 = arith.constant 0 : i32
    return %arg1, %arg2 : i32, i32
  }
  func.func @transform_4(%arg0: i32, %arg1: i32, %arg2: i32) -> (i32, i32) {
    %c0_i32 = arith.constant 0 : i32
    %c0_i32_0 = arith.constant 0 : i32
    return %c0_i32, %arg2 : i32, i32
  }
  func.func @transform_5(%arg0: i32, %arg1: i32, %arg2: i32) -> (i32, i32) {
    %c0_i32 = arith.constant 0 : i32
    %c0_i32_0 = arith.constant 0 : i32
    return %c0_i32, %arg1 : i32, i32
  }
  func.func @transform_6(%arg0: i32, %arg1: i32, %arg2: i32) -> (i32, i32) {
    %c0_i32 = arith.constant 0 : i32
    %c0_i32_0 = arith.constant 0 : i32
    return %c0_i32, %arg1 : i32, i32
  }
  func.func @transform_7(%arg0: i32, %arg1: i32, %arg2: i32) -> (i32, i32) {
    %c0_i32 = arith.constant 0 : i32
    return %arg0, %arg1 : i32, i32
  }
  func.func @transform_8(%arg0: i32, %arg1: i32, %arg2: i32) -> (i32, i32) {
    %c0_i32 = arith.constant 0 : i32
    return %arg0, %arg1 : i32, i32
  }
}

</mosaic_0001>

<bundles_post_ra>
// kernel: tpu_custom_call.1
= control target key start
LH: loop header
LB: loop body
LE: loop exit
PB: predicated region body
PF: predicated region fallthrough
CT: control target
= control target key end

     0   :  { %s2276_s0 = inlined_call_operand.hbm [shape: bf16[8,384], index: 0, kind: input, shape index: {}]   ;;  %s2277_s1 = inlined_call_operand.hbm [shape: bf16[256,384], index: 1, kind: input, shape index: {}]   ;;  %s2278_s2 = inlined_call_operand.hbm [shape: bf16[256,384], index: 2, kind: input, shape index: {}]   ;;  %s2279_s3 = inlined_call_operand.hbm [shape: bf16[256,384], index: 3, kind: input, shape index: {}]   ;;  %s2280_s4 = inlined_call_operand.vmem [shape: f32[1,384], index: 4, kind: input, shape index: {}]   ;;  %s2281_s5 = inlined_call_operand.vmem [shape: f32[1,256], index: 5, kind: input, shape index: {}]   ;;  %s2282_s6 = inlined_call_operand.vmem [shape: f32[1,256], index: 6, kind: input, shape index: {}]   ;;  %s2283_s7 = inlined_call_operand.hbm [shape: f32[8,256], index: 7, kind: input, shape index: {}]   ;;  %s2284_s8 = inlined_call_operand.hbm [shape: f32[8,256], index: 8, kind: output, shape index: {}]  }
   0x1   :  { %2306 = sst [smem:[#allocation31_spill]] %s2277_s1 }
   0x2   :  { %2307 = sst [smem:[#allocation32_spill]] %s2279_s3 }
   0x3   :  { %2308 = sst [smem:[#allocation33_spill]] %s2280_s4 }
   0x4   :  { %2309 = sst [smem:[#allocation34_spill]] %s2281_s5 }
   0x5   :  { %2310 = sst [smem:[#allocation35_spill]] %s2282_s6 }
   0x6   :  { %2311 = sst [smem:[#allocation36_spill]] %s2283_s7 }
   0x7   :  { %2312 = sst [smem:[#allocation37_spill]] %s2284_s8 }
   0x8   :  { %13 = vsyncpa [#allocation5], 0 }
   0x9   :  { %15 = vsyncpa [#allocation5 + $0x1], 0 }
   0xa   :  { %16 = vsyncpa [#allocation8], 0 }
   0xb   :  { %18 = vsyncpa [#allocation8 + $0x1], 0 }
   0xc   :  { %19 = vsyncpa [#allocation11], 0 }
   0xd   :  { %21 = vsyncpa [#allocation11 + $0x1], 0 }
   0xe   :  { %22 = vsyncpa [#allocation6], 0 }
   0xf   :  { %24 = vsyncpa [#allocation6 + $0x1], 0  ;;  %s1754_s27 = smov 0   ;;  %s1756_s28 = smov 0  }
  0x10   :  { %s1758_s29 = smov 0   ;;  %s1760_s30 = smov 0  }
  0x11   :  { %s1762_s9 = smov 0   ;;  %s1764_s10 = smov 0  }
  0x12   :  { %s1766_s11 = smov 0   ;;  %s1768_s12 = smov 0  }
  0x13   :  { %s1770_s13 = smov 0   ;;  %s1772_s14 = smov 0  }
  0x14   :  { %s1774_s15 = smov 0   ;;  %s1776_s16 = smov 0  }
  0x15   :  { %s1778_s17 = smov 0   ;;  %s1780_s18 = smov 0  }
  0x16 LB: > { %2313 = sst [smem:[#allocation19_spill]] %s1643_s27  ;;  %p2302_p0 = scmp.eq.s32.totalorder %s1695_s18, 0  ;;  %s1695_s18 = sphi %s1780_s18, %s30_s18   ;;  %s1691_s17 = sphi %s1778_s17, %s2389_s17   ;;  %s1687_s16 = sphi %s1776_s16, %s2388_s16   ;;  %s1683_s15 = sphi %s1774_s15, %s2387_s15   ;;  %s1679_s14 = sphi %s1772_s14, %s2377_s14   ;;  %s1675_s13 = sphi %s1770_s13, %s2386_s13   ;;  %s1671_s12 = sphi %s1768_s12, %s2375_s12   ;;  %s1667_s11 = sphi %s1766_s11, %s2374_s11   ;;  %s1663_s10 = sphi %s1764_s10, %s2385_s10   ;;  %s1659_s9 = sphi %s1762_s9, %s2384_s9   ;;  %s1655_s30 = sphi %s1760_s30, %s2383_s30   ;;  %s1651_s29 = sphi %s1758_s29, %s2382_s29   ;;  %s1647_s28 = sphi %s1756_s28, %s2381_s28   ;;  %s1643_s27 = sphi %s1754_s27, %s2372_s27  }
  0x17   : > { %2314 = sst [smem:[#allocation20_spill]] %s1647_s28  ;;  %p93_p1 = scmp.ne.s32.totalorder %s1663_s10, %s1659_s9 }
  0x18   : > { %2315 = sst [smem:[#allocation21_spill]] %s1671_s12  ;;  %p99_p2 = scmp.ne.s32.totalorder %s1659_s9, %s1655_s30 }
  0x19   : > { %2316 = sst [smem:[#allocation22_spill]] %s1675_s13  ;;  %p2300_p3 = scmp.lt.s32.totalorder %s1695_s18, 6 }
  0x1a   : > { %2317 = sst [smem:[#allocation23_spill]] %s1679_s14  ;;  %p95_p4 = por %p93_p1, %p2302_p0 }
  0x1b   : > { %2318 = sst [smem:[#allocation24_spill]] %s1683_s15  ;;  %s335_s21 = sand.u32 1, %s1663_s10  }
  0x1c   : > { %2319 = sst [smem:[#allocation25_spill]] %s1687_s16  ;;  %s1835_s22 = sshll.u32 %s335_s21, 6 }
  0x1d   : > { %s1242_s23 = smul.u32 48, %s1691_s17  ;;  %p1840_p5 = pnand %p2300_p3, %p95_p4 }
  0x1e   : > { %s337_s26 = scalar_lea.vmem [#allocation7], %s1835_s22  ;;  %s2321_s1 = sld [smem:[#allocation31_spill]] }
  0x1f   : > { %s343_s25 = sadd.s32 %s1687_s16, %s1242_s23  ;;  %s346_s19 = sshll.u32 %s337_s26, 4  ;;  %s347_s19 = int_to_ptr.vmem [resolvable:$true] %s346_s19 }
  0x20   : > { %s1846_s8 = sshll.u32 %s343_s25, 6  ;;  %p1151_p6 = scmp.ge.s32.totalorder %s1695_s18, 1 }
  0x21   : > { %s2322_s5 = sand.u32 1, %s1695_s18   ;;  %p1401_p7 = pneg %p1840_p5 }
  0x22   : > { %s1855_s4 = scalar_lea.sflag [#allocation8], %s2322_s5  ;;  %s1412_s15 = scalar_lea.vmem %s347_s19, 1024 }
  0x23   : > { %p1413_p8 = scmp.ne.s32.totalorder %s347_s19, %s1412_s15  ;;  %s1697_s23 = smov [#allocation7]  }
  0x24   : > { %s345_s21 = scalar_lea.hbm %s2321_s1, %s1846_s8  ;;  %s1417_s25 = sshll.u32 %s1697_s23, 4  ;;  %s1418_s25 = int_to_ptr.vmem [resolvable:$false] %s1417_s25 }
  0x25   : > { %p1415_p9 = pnand %p1413_p8, %p1401_p7  ;;  %s1419_s26 = scalar_lea.vmem %s1418_s25, 2048 }
  0x26   : > { %p1420_p11 = scmp.lt.s32.totalorder %s347_s19, %s1418_s25  ;;  %p1421_p12 = scmp.lt.s32.totalorder %s1419_s26, %s1412_s15 }
  0x27   : > { %p1416_p10 = pneg %p1415_p9 }
  0x28   : > { %p1422_p13 = por %p1421_p12, %p1420_p11 }
  0x2a   : > { %p1423_p1 = pnand %p1422_p13, %p1416_p10 }
  0x2c   : > { %1426 = shalt.err (!%p1423_p1)
}
  0x2d   : > { %s2290_s6 = smov 192   ;;  %s2291_s5 = smov 64  }
  0x2e   : > { %s2292_s20 = smov 4   ;;  %p438_p4 = scmp.lt.s32.totalorder %s1695_s18, 7 }
  0x2f   : > { %1263 = dma.hbm_to_vmem [thread:$0]  (!%p1840_p5), %s345_s21, 1024, %s347_s19, %s1855_s4, %s2290_s6, %s2291_s5, %s2292_s20  }
  0x30   : > { %s2323_s3 = sld [smem:[#allocation32_spill]]  ;;  %p1875_p8 = pnand %p1151_p6, %p438_p4 }
  0x31   : > { %s383_s1 = scalar_lea.vmem [#allocation10], %s1835_s22  ;;  %s2325_s7 = sand.u32 1, %s1695_s18  }
  0x32   : > { %s392_s14 = sshll.u32 %s383_s1, 4  ;;  %s1882_s27 = scalar_lea.sflag [#allocation11], %s2325_s7  ;;  %s393_s14 = int_to_ptr.vmem [resolvable:$true] %s392_s14 }
  0x33   : > { %s1440_s28 = scalar_lea.vmem %s393_s14, 1024  ;;  %s1701_s19 = smov [#allocation10]  }
  0x34   : > { %p1441_p9 = scmp.ne.s32.totalorder %s393_s14, %s1440_s28  ;;  %s1445_s21 = sshll.u32 %s1701_s19, 4  ;;  %s1446_s21 = int_to_ptr.vmem [resolvable:$false] %s1445_s21 }
  0x35   : > { %s1447_s15 = scalar_lea.vmem %s1446_s21, 2048  ;;  %p1448_p6 = scmp.lt.s32.totalorder %s393_s14, %s1446_s21 }
  0x36   : > { %s391_s25 = scalar_lea.hbm %s2323_s3, %s1846_s8  ;;  %p1443_p10 = pnand %p1441_p9, %p1401_p7 }
  0x37   : > { %p1449_p12 = scmp.lt.s32.totalorder %s1447_s15, %s1440_s28 }
  0x38   : > { %p1444_p11 = pneg %p1443_p10 }
  0x39   : > { %p1450_p13 = por %p1449_p12, %p1448_p6 }
  0x3b   : > { %p1451_p1 = pnand %p1450_p13, %p1444_p11 }
  0x3d   : > { %1454 = shalt.err (!%p1451_p1)
}
  0x3e   : > { %1269 = dma.hbm_to_vmem [thread:$0]  (!%p1840_p5), %s391_s25, 1024, %s393_s14, %s1882_s27, %s2290_s6, %s2291_s5, %s2292_s20  }
  0x3f   : > { %s1894_s1 = sadd.s32 4294967295, %s1695_s18   ;;  %s42_s7 = sadd.s32 1, %s1687_s16 }
  0x40   : > { %s45_s28 = sadd.s32 1, %s1691_s17  ;;  %p43_p4 = scmp.ge.s32.totalorder %s42_s7, 3 }
  0x41   : > { %s58_s23 = sadd.s32 1, %s1675_s13  ;;  %p65_p9 = scmp.ne.s32.totalorder %s1675_s13, %s1671_s12 }
  0x42   : > { %p71_p10 = scmp.ne.s32.totalorder %s1671_s12, %s1667_s11  ;;  %s2391_s7 = smov (%p43_p4, %s42_s7), 0 }
  0x43   : > { %2326 = sst [smem:[#allocation26_spill]] %s2391_s7  ;;  %s2393_s28 = smov (!%p43_p4, %s45_s28), %s1691_s17 }
  0x44   : > { %s54_s14 = ssub.s32 %s1687_s16, %s2391_s7  ;;  %p1910_p11 = por %p2302_p0, %p65_p9 }
  0x45   : > { %p47_p6 = scmp.ge.s32.totalorder %s2393_s28, 2  ;;  %p56_p12 = scmp.eq.s32.totalorder %s54_s14, 0 }
  0x46   : > { %p2301_p13 = scmp.eq.s32.totalorder %s1894_s1, 0  ;;  %s313_s19 = sand.u32 1, %s1675_s13  }
  0x47   : > { %s2395_s28 = smov (%p47_p6, %s2393_s28), 0  ;;  %s1135_s20 = sshll.u32 %s313_s19, 2 }
  0x48   : > { %2328 = sst [smem:[#allocation27_spill]] %s2395_s28  ;;  %p1923_p1 = por %p2301_p13, %p71_p10 }
  0x49   : > { %s1919_s11 = scalar_select %p56_p12, %s1675_s13, %s58_s23  }
  0x4a   : > { %s2330_s21 = scalar_select %p1923_p1, 1, 0 }
  0x4b   : > { %2329 = sst [smem:[#allocation28_spill]] %s1919_s11  ;;  %s1929_s15 = ssub.s32 %s1691_s17, %s2395_s28 }
  0x4c   : > { %2331 = sst [smem:[#allocation29_spill]] %s2330_s21  ;;  %s83_s6 = sor.u32 %s1929_s15, %s54_s14 }
  0x4d   : > { %p1937_p4 = por %p99_p2, %p2301_p13  ;;  %p84_p9 = scmp.eq.s32.totalorder %s83_s6, 0 }
  0x4e   : > { %s1136_s3 = sshll.u32 %s1687_s16, 6  ;;  %s2333_s23 = sadd.s32 1, %s1663_s10 }
  0x4f   : > { %s1945_s7 = scalar_select %p84_p9, %s1663_s10, %s2333_s23  }
  0x50   : > { %s324_s21 = scalar_lea.hbm %s2276_s0, %s1136_s3  ;;  %s317_s28 = scalar_lea.vmem [#allocation4], %s1135_s20 }
  0x51   : > { %2334 = sst [smem:[#allocation30_spill]] %s1945_s7  ;;  %s326_s12 = sshll.u32 %s317_s28, 4  ;;  %s327_s12 = int_to_ptr.vmem [resolvable:$true] %s326_s12 }
  0x52   : > { %p1954_p10 = pnand %p2300_p3, %p1910_p11  ;;  %s368_s16 = scalar_lea.hbm %s2278_s2, %s1846_s8 }
  0x53   : > { %s314_s23 = scalar_lea.sflag [#allocation5], %s313_s19  ;;  %s1468_s7 = scalar_lea.vmem %s327_s12, 64 }
  0x54   : > { %p1457_p2 = pneg %p1954_p10  ;;  %p1469_p6 = scmp.ne.s32.totalorder %s327_s12, %s1468_s7 }
  0x55   : > { %s1702_s3 = smov [#allocation4]  }
  0x56   : > { %p1471_p12 = pnand %p1469_p6, %p1457_p2  ;;  %s1473_s13 = sshll.u32 %s1702_s3, 4  ;;  %s1474_s13 = int_to_ptr.vmem [resolvable:$false] %s1473_s13 }
  0x57   : > { %s1475_s20 = scalar_lea.vmem %s1474_s13, 128  ;;  %p1476_p11 = scmp.lt.s32.totalorder %s327_s12, %s1474_s13 }
  0x58   : > { %p1472_p9 = pneg %p1471_p12  ;;  %p1477_p3 = scmp.lt.s32.totalorder %s1475_s20, %s1468_s7 }
  0x5a   : > { %p1478_p13 = por %p1477_p3, %p1476_p11 }
  0x5c   : > { %p1479_p0 = pnand %p1478_p13, %p1472_p9 }
  0x5e   : > { %1482 = shalt.err (!%p1479_p0)
}
  0x5f   : > { %1260 = dma.hbm_to_vmem [thread:$0]  (!%p1954_p10), %s324_s21, 64, %s327_s12, %s314_s23  }
  0x60   : > { %s360_s28 = scalar_lea.vmem [#allocation9], %s1835_s22  ;;  %s1703_s11 = smov [#allocation9]  }
  0x61   : > { %s369_s25 = sshll.u32 %s360_s28, 4  ;;  %s1501_s6 = sshll.u32 %s1703_s11, 4  ;;  %s370_s25 = int_to_ptr.vmem [resolvable:$true] %s369_s25  ;;  %s1502_s6 = int_to_ptr.vmem [resolvable:$false] %s1501_s6 }
  0x62   : > { %s1496_s19 = scalar_lea.vmem %s370_s25, 1024  ;;  %s1503_s7 = scalar_lea.vmem %s1502_s6, 2048 }
  0x63   : > { %p1497_p2 = scmp.ne.s32.totalorder %s370_s25, %s1496_s19  ;;  %p1504_p3 = scmp.lt.s32.totalorder %s370_s25, %s1502_s6 }
  0x64   : > { %p1505_p0 = scmp.lt.s32.totalorder %s1503_s7, %s1496_s19 }
  0x65   : > { %p1499_p6 = pnand %p1497_p2, %p1401_p7 }
  0x66   : > { %p1506_p13 = por %p1505_p0, %p1504_p3 }
  0x67   : > { %p1500_p12 = pneg %p1499_p6 }
  0x69   : > { %p1507_p9 = pnand %p1506_p13, %p1500_p12 }
  0x6b   : > { %1510 = shalt.err (!%p1507_p9)
}
  0x6c   : > { %s2336_s12 = smov 4   ;;  %s2337_s22 = smov 64  }
  0x6d   : > { %s2338_s21 = smov 192   ;;  %s2339_s23 = sld [smem:[#allocation20_spill]] }
  0x6e   : > { %s2340_s3 = sld [smem:[#allocation19_spill]]  ;;  %s1132_s24 = sadd.s32 4294967294, %s1695_s18  }
  0x6f   : > { %1266 = dma.hbm_to_vmem [thread:$0]  (!%p1840_p5), %s368_s16, 1024, %s370_s25, %s1855_s4, %s2338_s21, %s2337_s22, %s2336_s12  }
  0x70   : > { %p246_p7 = scmp.eq.s32.totalorder %s1929_s15, 0  ;;  %s248_s13 = sadd.s32 1, %s1651_s29 }
  0x71   : > { %p2341_p11 = scmp.eq.s32.totalorder %s1695_s18, 0  ;;  %p287_p12 = scmp.eq.s32.totalorder %s1894_s1, 5 }
  0x72   : > { %s1987_s8 = scalar_select %p246_p7, %s1651_s29, %s248_s13  }
  0x73   : > { %p255_p10 = scmp.ne.s32.totalorder %s1651_s29, %s2339_s23  ;;  %p293_p3 = scmp.eq.s32.totalorder %s1132_s24, 5 }
  0x74   : > { %p261_p6 = scmp.ne.s32.totalorder %s2339_s23, %s2340_s3  ;;  %p2343_p0 = scmp.eq.s32.totalorder %s1894_s1, 0 }
  0x75   : > { %p1991_p2 = por %p255_p10, %p2341_p11  ;;  %s422_s4 = sand.u32 1, %s1651_s29  }
  0x76   : > { %p2000_p13 = por %p261_p6, %p2343_p0  ;;  %p2005_p5 = por %p287_p12, %p255_p10 }
  0x77   : > { %p2009_p9 = por %p293_p3, %p261_p6  ;;  %s1149_s25 = sshll.u32 %s422_s4, 3 }
  0x78   : > { %s2344_s28 = scalar_select %p2000_p13, 1, 0 }
  0x79   : > { %s2345_s16 = scalar_select %p2005_p5, 1, 0 }
  0x7a   : > { %s2346_s15 = scalar_select %p2009_p9, 1, 0 }
  0x7b   : > { %s1150_s19 = sshll.u32 %s1691_s17, 7  ;;  %s2347_s7 = sld [smem:[#allocation36_spill]] }
  0x7c   : > { %s424_s22 = scalar_lea.vmem [#allocation12], %s1149_s25  ;;  %p2348_p7 = scmp.lt.s32.totalorder %s1695_s18, 6 }
  0x7d   : > { %s433_s21 = sshll.u32 %s424_s22, 4  ;;  %s1704_s23 = smov [#allocation12]   ;;  %s434_s21 = int_to_ptr.vmem [resolvable:$true] %s433_s21 }
  0x7e   : > { %p2021_p11 = pnand %p2348_p7, %p1991_p2  ;;  %s1524_s14 = scalar_lea.vmem %s434_s21, 128 }
  0x7f   : > { %p1525_p6 = scmp.ne.s32.totalorder %s434_s21, %s1524_s14  ;;  %s1529_s3 = sshll.u32 %s1704_s23, 4  ;;  %s1530_s3 = int_to_ptr.vmem [resolvable:$false] %s1529_s3 }
  0x80   : > { %p1513_p10 = pneg %p2021_p11  ;;  %s1531_s24 = scalar_lea.vmem %s1530_s3, 256 }
  0x81   : > { %s431_s12 = scalar_lea.hbm %s2347_s7, %s1150_s19  ;;  %p1532_p0 = scmp.lt.s32.totalorder %s434_s21, %s1530_s3 }
  0x82   : > { %p1527_p12 = pnand %p1525_p6, %p1513_p10  ;;  %p1533_p9 = scmp.lt.s32.totalorder %s1531_s24, %s1524_s14 }
  0x84   : > { %p1528_p3 = pneg %p1527_p12  ;;  %p1534_p5 = por %p1533_p9, %p1532_p0 }
  0x86   : > { %p1535_p13 = pnand %p1534_p5, %p1528_p3 }
  0x88   : > { %1538 = shalt.err (!%p1535_p13)
}
  0x89   : > { %1272 = dma.hbm_to_vmem [thread:$0]  (!%p2021_p11), %s431_s12, 128, %s434_s21, %s1882_s27  }
  0x8a   : > { %442 = sbr.rel (%p1875_p8) target bundleno = 514 (0x202), region = 52  ;;  %s2350_s13 = sld [smem:[#allocation21_spill]] (!%p1875_p8) }
  0x90   : > { %s444_s4 = sand.u32 1, %s2350_s13  }
  0x91   : > { %s2033_s25 = sshll.u32 %s444_s4, 2  ;;  %s445_s19 = scalar_lea.sflag [#allocation5], %s444_s4 }
  0x92   : > { %1622 = dma.done.wait (%p1923_p1), %s445_s19, 64  }
  0x93   : > { %1624 = vsyncadd (%p1923_p1), %s445_s19, 4294967232  ;;  %s453_s27 = sand.u32 1, %s1894_s1   ;;  %s455_s6 = sand.u32 1, %s1659_s9  }
  0x94   : > { %s1153_s26 = sshll.u32 %s455_s6, 6  ;;  %s454_s7 = scalar_lea.sflag [#allocation8], %s453_s27 }
  0x95   : > { %s2042_s12 = scalar_lea.vmem [#allocation7], %s1153_s26 }
  0x96   : > { %1626 = dma.done.wait (%p1937_p4), %s454_s7, 2048  }
  0x97   : > { %1628 = vsyncadd (%p1937_p4), %s454_s7, 4294965248  ;;  %s2048_s22 = scalar_lea.vmem [#allocation9], %s1153_s26  ;;  %s472_s21 = scalar_lea.sflag [#allocation11], %s453_s27 }
  0x98   : > { %s2050_s30 = scalar_lea.vmem [#allocation10], %s1153_s26 }
  0x99   : > { %1630 = dma.done.wait (%p1937_p4), %s472_s21, 1024  }
  0x9a   : > { %1632 = vsyncadd (%p1937_p4), %s472_s21, 4294966272  ;;  %s2352_s1 = sld [smem:[#allocation20_spill]]  ;;  %p2353_p8 = scmp.ne.s32.totalorder %s2344_s28, 0 }
  0xa0   : > { %s2305_s14 = sand.u32 1, %s2352_s1  }
  0xa1   : > { %s2059_s23 = sshll.u32 %s2305_s14, 3 }
  0xa2   : > { %1634 = dma.done.wait (%p2353_p8), %s472_s21, 128  }
  0xa3   : > { %1636 = vsyncadd (%p2353_p8), %s472_s21, 4294967168  ;;  %s2354_s24 = sld [smem:[#allocation23_spill]]  ;;  %s545_s11 = scalar_lea.vmem [#allocation13], %s2059_s23 }
  0xa4   : > { %s2355_s13 = sld [smem:[#allocation24_spill]] }
  0xa5   : > { %s2356_s19 = sld [smem:[#allocation33_spill]] }
  0xa6   : > { %s2357_s28 = sld [smem:[#allocation34_spill]] }
  0xa7   : > { %s2358_s14 = sld [smem:[#allocation35_spill]] }
  0xa9   : > { %p549_p1 = scmp.lt.s32.totalorder %s2354_s24, 2  ;;  %p1158_p2 = scmp.ne.s32.totalorder %s2354_s24, 0 }
  0xaa   : > { %p552_p4 = scmp.lt.s32.totalorder %s2355_s13, 1 }
  0xab   : > { %s550_s5 = scalar_select %p549_p1, %s2354_s24, 2 }
  0xac   : > { %s2397_s13 = smov (!%p552_p4, %s2355_s13), 1  ;;  %562 = sbr.rel (%p1158_p2) target bundleno = 179 (0xb3), region = 76 }
  0xad   : > { %s551_s27 = scalar_lea.vmem %s2356_s19, %s550_s5  ;;  %s554_s7 = scalar_lea.vmem %s2357_s28, %s2397_s13 }
  0xae   : > { %s557_s3 = scalar_lea.vmem %s2358_s14, %s2397_s13 }
  0xb1   : > { %v1705_v0 = vmov 0.0  }
  0xb2   : > { %563 = vst [vmem:[#allocation2] sm:$0xff] %v1705_v0  ;;  %564 = vst [vmem:[#allocation3] sm:$0xff] %v1705_v0 }
  0xb3 PF: > { %v565_v1 = vld [vmem:[%s551_s27] sm:$0x1]  ;;  %v588_v2 = vlaneseq  ;;  %v1706_v3 = vmov 0.0   ;;  %vm1707_vm0 = vmmov 0   ;;  %v583_v12 = vld [vmem:[%s2042_s12 + $0x38] sm:$0xf] }
  0xb4   : > { %1202 = vmatprep.subr.bf16.mxu0 %v1706_v3  ;;  %v566_v4 = vpack.c.bf16 %v565_v1, %v565_v1  ;;  %v567_v5 = vmul.f32 %v565_v1, %v565_v1  ;;  %1222 = vmatprep.subr.bf16.mxu1 %v1706_v3  ;;  %v584_v13 = vld [vmem:[%s2042_s12 + $0x3c] sm:$0xf]  ;;  %v642_v16 = vld [vmem:[%s2050_s30 + $0x38] sm:$0xf]  ;;  %v640_v23 = vld [vmem:[%s2050_s30 + $0x30] sm:$0xf] }
  0xb5   : > { %v589_v6 = vshrl.u32 %v588_v2, 7  ;;  %1218 = vmatprep.mubr.msk.bf16.mxu0 %vm1707_vm0, %v1706_v3  ;;  %1238 = vmatprep.mubr.msk.bf16.mxu1 %vm1707_vm0, %v1706_v3  ;;  %v643_v17 = vld [vmem:[%s2050_s30 + $0x3c] sm:$0xf]  ;;  %v626_v18 = vld [vmem:[%s2048_s22 + $0x38] sm:$0xf] }
  0xb6   : > { %v586_v7 = vpack.i.b16 %v566_v4, %v566_v4  ;;  %v568_v8 = vpack.c.bf16 %v567_v5, %v567_v5  ;;  %v627_v22 = vld [vmem:[%s2048_s22 + $0x3c] sm:$0xf]  ;;  %v641_v24 = vld [vmem:[%s2050_s30 + $0x34] sm:$0xf]  ;;  %v581_v27 = vld [vmem:[%s2042_s12 + $0x30] sm:$0xf] }
  0xb7   : > { %v590_v9 = vsub.s32 0, %v589_v6  ;;  %v582_v28 = vld [vmem:[%s2042_s12 + $0x34] sm:$0xf]  ;;  %v624_v36 = vld [vmem:[%s2048_s22 + $0x30] sm:$0xf] }
  0xb8   : > { %v645_v10 = vpack.i.b16 %v568_v8, %v568_v8  ;;  %v625_v37 = vld [vmem:[%s2048_s22 + $0x34] sm:$0xf]  ;;  %v638_v42 = vld [vmem:[%s2050_s30 + $0x28] sm:$0xf]  ;;  %v639_v43 = vld [vmem:[%s2050_s30 + $0x2c] sm:$0xf] }
  0xb9   : > { %v591_v11 = vrot.slane %v586_v7, %v590_v9  ;;  %v579_v44 = vld [vmem:[%s2042_s12 + $0x28] sm:$0xf]  ;;  %v580_v45 = vld [vmem:[%s2042_s12 + $0x2c] sm:$0xf]  ;;  %v636_v56 = vld [vmem:[%s2050_s30 + $0x20] sm:$0xf] }
  0xba   : > { %v650_v14 = vrot.slane %v645_v10, %v590_v9  ;;  %v622_v51 = vld [vmem:[%s2048_s22 + $0x28] sm:$0xf]  ;;  %v623_v52 = vld [vmem:[%s2048_s22 + $0x2c] sm:$0xf]  ;;  %v637_v57 = vld [vmem:[%s2050_s30 + $0x24] sm:$0xf] }
  0xbb   : > { %v2091_v15 = vcombine.low %v591_v11, %v591_v11  ;;  %v577_v58 = vld [vmem:[%s2042_s12 + $0x20] sm:$0xf]  ;;  %v578_v59 = vld [vmem:[%s2042_s12 + $0x24] sm:$0xf]  ;;  %v634_v7 = vld [vmem:[%s2050_s30 + $0x18] sm:$0xf] }
  0xbc   : > { %v2096_v19 = vcombine.low %v650_v14, %v650_v14  ;;  %v620_v1 = vld [vmem:[%s2048_s22 + $0x20] sm:$0xf]  ;;  %v621_v2 = vld [vmem:[%s2048_s22 + $0x24] sm:$0xf]  ;;  %v635_v8 = vld [vmem:[%s2050_s30 + $0x1c] sm:$0xf] }
  0xbd   : > { %v610_v20 = vmul.bf16 %v2091_v15, %v583_v12  ;;  %v611_v21 = vmul.bf16 %v2091_v15, %v584_v13  ;;  %v608_v34 = vmul.bf16 %v2091_v15, %v581_v27  ;;  %v609_v35 = vmul.bf16 %v2091_v15, %v582_v28  ;;  %v575_v9 = vld [vmem:[%s2042_s12 + $0x18] sm:$0xf]  ;;  %v576_v10 = vld [vmem:[%s2042_s12 + $0x1c] sm:$0xf] }
  0xbe   : > { %v669_v25 = vmul.bf16 %v2096_v19, %v642_v16  ;;  %v670_v26 = vmul.bf16 %v2096_v19, %v643_v17  ;;  %v667_v32 = vmul.bf16 %v2096_v19, %v640_v23  ;;  %v668_v33 = vmul.bf16 %v2096_v19, %v641_v24  ;;  %v618_v17 = vld [vmem:[%s2048_s22 + $0x18] sm:$0xf]  ;;  %v632_v23 = vld [vmem:[%s2050_s30 + $0x10] sm:$0xf]  ;;  %v633_v24 = vld [vmem:[%s2050_s30 + $0x14] sm:$0xf] }
  0xbf   : > { %v1168_v29 = vcombine.low %v610_v20, %v611_v21  ;;  %v1167_v41 = vcombine.low %v608_v34, %v609_v35  ;;  %v665_v47 = vmul.bf16 %v2096_v19, %v638_v42  ;;  %v666_v48 = vmul.bf16 %v2096_v19, %v639_v43 }
  0xc0   : > { %v685_v30 = vadd.bf16 %v669_v25, %v626_v18  ;;  %v686_v31 = vadd.bf16 %v670_v26, %v627_v22  ;;  %v683_v39 = vadd.bf16 %v667_v32, %v624_v36  ;;  %v684_v40 = vadd.bf16 %v668_v33, %v625_v37  ;;  %v619_v18 = vld [vmem:[%s2048_s22 + $0x1c] sm:$0xf]  ;;  %v573_v25 = vld [vmem:[%s2042_s12 + $0x10] sm:$0xf]  ;;  %v574_v26 = vld [vmem:[%s2042_s12 + $0x14] sm:$0xf] }
  0xc1   : > { %1203 = vmatpush3.bf16.xpose.msra.mxu0 %v1168_v29  ;;  %v606_v49 = vmul.bf16 %v2091_v15, %v579_v44  ;;  %v607_v50 = vmul.bf16 %v2091_v15, %v580_v45  ;;  %v681_v53 = vadd.bf16 %v665_v47, %v622_v51  ;;  %v682_v54 = vadd.bf16 %v666_v48, %v623_v52  ;;  %v616_v32 = vld [vmem:[%s2048_s22 + $0x10] sm:$0xf]  ;;  %v617_v33 = vld [vmem:[%s2048_s22 + $0x14] sm:$0xf]  ;;  %v630_v37 = vld [vmem:[%s2050_s30 + $0x8] sm:$0xf] }
  0xc2   : > { %v1176_v38 = vcombine.low %v685_v30, %v686_v31  ;;  %1204 = vmatprep.subr.bf16.mxu0 %v1706_v3  ;;  %v1175_v46 = vcombine.low %v683_v39, %v684_v40  ;;  %v663_v61 = vmul.bf16 %v2096_v19, %v636_v56  ;;  %v664_v62 = vmul.bf16 %v2096_v19, %v637_v57  ;;  %v571_v39 = vld [vmem:[%s2042_s12 + $0x8] sm:$0xf]  ;;  %v572_v40 = vld [vmem:[%s2042_s12 + $0xc] sm:$0xf]  ;;  %v628_v51 = vld [vmem:[%s2050_s30] sm:$0xf] }
  0xc3   : > { %v1166_v55 = vcombine.low %v606_v49, %v607_v50  ;;  %v1174_v60 = vcombine.low %v681_v53, %v682_v54  ;;  %v604_v63 = vmul.bf16 %v2091_v15, %v577_v58  ;;  %v605_v0 = vmul.bf16 %v2091_v15, %v578_v59  ;;  %v615_v47 = vld [vmem:[%s2048_s22 + $0xc] sm:$0xf]  ;;  %v629_v52 = vld [vmem:[%s2050_s30 + $0x4] sm:$0xf]  ;;  %v569_v53 = vld [vmem:[%s2042_s12] sm:$0xf] }
  0xc4   : > { %1223 = vmatpush3.bf16.xpose.msra.mxu1 %v1176_v38  ;;  %v679_v4 = vadd.bf16 %v663_v61, %v620_v1  ;;  %v680_v5 = vadd.bf16 %v664_v62, %v621_v2  ;;  %v661_v12 = vmul.bf16 %v2096_v19, %v634_v7  ;;  %v662_v13 = vmul.bf16 %v2096_v19, %v635_v8  ;;  %v631_v38 = vld [vmem:[%s2050_s30 + $0xc] sm:$0xf]  ;;  %v570_v54 = vld [vmem:[%s2042_s12 + $0x4] sm:$0xf]  ;;  %s2359_s30 = scalar_lea.vmem [#allocation4], %s2033_s25  ;;  %v782_v8 = vld [vmem:[#allocation3] sm:$0xff] }
  0xc5   : > { %1224 = vmatprep.subr.bf16.mxu1 %v1706_v3  ;;  %v1165_v6 = vcombine.low %v604_v63, %v605_v0  ;;  %v602_v14 = vmul.bf16 %v2091_v15, %v575_v9  ;;  %v603_v16 = vmul.bf16 %v2091_v15, %v576_v10  ;;  %v659_v28 = vmul.bf16 %v2096_v19, %v632_v23  ;;  %v613_v61 = vld [vmem:[%s2048_s22 + $0x4] sm:$0xf]  ;;  %v687_v0 = vld [vmem:[%s2359_s30] sm:$0xf]  ;;  %s2360_s25 = sld [smem:[#allocation23_spill]] }
  0xc6   : > { %v1173_v11 = vcombine.low %v679_v4, %v680_v5  ;;  %v677_v20 = vadd.bf16 %v661_v12, %v618_v17  ;;  %v678_v21 = vadd.bf16 %v662_v13, %v619_v18  ;;  %v660_v29 = vmul.bf16 %v2096_v19, %v633_v24 }
  0xc7   : > { %v1164_v22 = vcombine.low %v602_v14, %v603_v16  ;;  %v600_v30 = vmul.bf16 %v2091_v15, %v573_v25  ;;  %v601_v31 = vmul.bf16 %v2091_v15, %v574_v26  ;;  %v675_v34 = vadd.bf16 %v659_v28, %v616_v32 }
  0xc8   : > { %v1172_v27 = vcombine.low %v677_v20, %v678_v21  ;;  %v676_v35 = vadd.bf16 %v660_v29, %v617_v33  ;;  %v657_v42 = vmul.bf16 %v2096_v19, %v630_v37  ;;  %v658_v43 = vmul.bf16 %v2096_v19, %v631_v38 }
  0xc9   : > { %1205 = vmatpush3.bf16.xpose.msra.mxu0 %v1167_v41  ;;  %v1163_v36 = vcombine.low %v600_v30, %v601_v31  ;;  %v598_v44 = vmul.bf16 %v2091_v15, %v571_v39  ;;  %v599_v45 = vmul.bf16 %v2091_v15, %v572_v40  ;;  %v655_v56 = vmul.bf16 %v2096_v19, %v628_v51 }
  0xca   : > { %1206 = vmatprep.subr.bf16.mxu0 %v1706_v3  ;;  %v1171_v41 = vcombine.low %v675_v34, %v676_v35  ;;  %v674_v49 = vadd.bf16 %v658_v43, %v615_v47  ;;  %v656_v57 = vmul.bf16 %v2096_v19, %v629_v52  ;;  %v596_v58 = vmul.bf16 %v2091_v15, %v569_v53 }
  0xcb   : > { %v1162_v50 = vcombine.low %v598_v44, %v599_v45  ;;  %v597_v59 = vmul.bf16 %v2091_v15, %v570_v54  ;;  %v688_v2 = vunpack.c.l.bf16 %v687_v0  ;;  %v691_v15 = vld [vmem:[#allocation2] sm:$0xff]  ;;  %p1177_p13 = scmp.ne.s32.totalorder %s2360_s25, 2 }
  0xcc   : > { %1225 = vmatpush3.bf16.xpose.msra.mxu1 %v1175_v46  ;;  %v614_v46 = vld [vmem:[%s2048_s22 + $0x8] sm:$0xf]  ;;  %v672_v63 = vadd.bf16 %v656_v57, %v613_v61  ;;  %s2363_s4 = scalar_lea.vmem (!%p1177_p13), [#allocation12], %s2059_s23 }
  0xcd   : > { %1226 = vmatprep.subr.bf16.mxu1 %v1706_v3  ;;  %v673_v48 = vadd.bf16 %v657_v42, %v614_v46  ;;  %v1161_v1 = vcombine.low %v596_v58, %v597_v59  ;;  %v689_v19 = vmul.f32 %v688_v2, %v688_v2 }
  0xcf   : > { %v690_v5 = vpack.c.bf16 %v689_v19, %v689_v19 }
  0xd1   : > { %1207 = vmatpush3.bf16.xpose.msra.mxu0 %v1166_v55  ;;  %v1170_v55 = vcombine.low %v673_v48, %v674_v49 }
  0xd2   : > { %1208 = vmatprep.subr.bf16.mxu0 %v1706_v3 }
  0xd4   : > { %1227 = vmatpush3.bf16.xpose.msra.mxu1 %v1174_v60  ;;  %v612_v60 = vld [vmem:[%s2048_s22] sm:$0xf] }
  0xd5   : > { %1228 = vmatprep.subr.bf16.mxu1 %v1706_v3  ;;  %v671_v62 = vadd.bf16 %v655_v56, %v612_v60 }
  0xd7   : > { %v1169_v4 = vcombine.low %v671_v62, %v672_v63 }
  0xd9   : > { %1209 = vmatpush3.bf16.xpose.msra.mxu0 %v1165_v6 }
  0xda   : > { %1210 = vmatprep.subr.bf16.mxu0 %v1706_v3 }
  0xdc   : > { %1229 = vmatpush3.bf16.xpose.msra.mxu1 %v1173_v11 }
  0xdd   : > { %1230 = vmatprep.subr.bf16.mxu1 %v1706_v3 }
  0xe1   : > { %1211 = vmatpush3.bf16.xpose.msra.mxu0 %v1164_v22 }
  0xe2   : > { %1212 = vmatprep.subr.bf16.mxu0 %v1706_v3 }
  0xe4   : > { %1231 = vmatpush3.bf16.xpose.msra.mxu1 %v1172_v27 }
  0xe5   : > { %1232 = vmatprep.subr.bf16.mxu1 %v1706_v3 }
  0xe9   : > { %1213 = vmatpush3.bf16.xpose.msra.mxu0 %v1163_v36 }
  0xea   : > { %1214 = vmatprep.subr.bf16.mxu0 %v1706_v3 }
  0xec   : > { %1233 = vmatpush3.bf16.xpose.msra.mxu1 %v1171_v41 }
  0xed   : > { %1234 = vmatprep.subr.bf16.mxu1 %v1706_v3 }
  0xf1   : > { %1215 = vmatpush3.bf16.xpose.msra.mxu0 %v1162_v50 }
  0xf2   : > { %1216 = vmatprep.subr.bf16.mxu0 %v1706_v3 }
  0xf4   : > { %1235 = vmatpush3.bf16.xpose.msra.mxu1 %v1170_v55 }
  0xf5   : > { %1236 = vmatprep.subr.bf16.mxu1 %v1706_v3 }
  0xf9   : > { %1217 = vmatpush3.bf16.xpose.msra.mxu0 %v1161_v1 }
  0xfc   : > { %1237 = vmatpush3.bf16.xpose.msra.mxu1 %v1169_v4 }
 0x100   : > { %1219 = vmatmul.mubr.bf16.vlgmr.msra.gmra.mxu0 %v687_v0 }
 0x103   : > { %1239 = vmatmul.mubr.bf16.vlgmr.msra.gmra.mxu1 %v690_v5 }
 0x1c0   : > { %v774_v6 = vpop.f32.mrf.mxu0 }
 0x1c1   : > { %v780_v7 = vadd.f32 %v774_v6, %v691_v15 }
 0x1c2   : > { %v1220_v9 = vpop.f32.mrf.mxu0 }
 0x1c3   : > { %781 = vst [vmem:[#allocation2] sm:$0xff] %v780_v7  ;;  %v865_v10 = vpop.f32.mrf.mxu1 }
 0x1c4   : > { %v871_v11 = vadd.f32 %v865_v10, %v782_v8  ;;  %v777_v12 = vpop.f32.mrf.mxu0 }
 0x1c5   : > { %v1240_v13 = vpop.f32.mrf.mxu1  ;;  %876 = sbr.rel (%p1177_p13) target bundleno = 487 (0x1e7), region = 80 }
 0x1c6   : > { %872 = vst [vmem:[#allocation3] sm:$0xff] %v871_v11  ;;  %v1221_v3 = vpop.f32.mrf.mxu0 }
 0x1c7   : > { %v868_v14 = vpop.f32.mrf.mxu1 }
 0x1c9   : > { %v1241_v16 = vpop.f32.mrf.mxu1 }
 0x1ca   : > { %v1179_v18 = vld [vmem:[%s557_s3] ss:$0 sm:$0xff] }
 0x1cb   : > { %v877_v22 = vld [vmem:[#allocation2] sm:$0xff] }
 0x1cc   : > { %v1178_v23 = vld [vmem:[%s554_s7] ss:$0 sm:$0xff] }
 0x1cd   : > { %v886_v17 = vld [vmem:[#allocation3] sm:$0xff]  ;;  %v902_v26 = vld [vmem:[%s2363_s4] sm:$0xff]  ;;  %v885_v27 = vadd.f32 %v1178_v23, %v877_v22 }
 0x1ce   : > { %v894_v20 = vadd.f32 %v1179_v18, %v886_v17 }
 0x1d0   : > { %1397 = vrsqrt.f32 %v894_v20  ;;  %vm897_vm1 = vcmp.eq.f32.partialorder %v894_v20, inf  ;;  %v900_v24 = vand.u32 2147483648, %v894_v20  ;;  %vm899_vm2 = vcmp.eq.f32.partialorder %v894_v20, 0.0 }
 0x1dd   : > { %v1398_v21 = vpop.eup %1397 }
 0x1de   : > { %v896_v25 = vmul.f32 %v1398_v21, %v894_v20 }
 0x1e0   : > { %v898_v28 = vsel %vm897_vm1, %v894_v20, %v896_v25 }
 0x1e1   : > { %v901_v29 = vsel %vm899_vm2, %v900_v24, %v898_v28 }
 0x1e2   : > { %v903_v30 = vmul.f32 %v902_v26, %v901_v29 }
 0x1e4   : > { %v904_v31 = vadd.f32 %v903_v30, %v885_v27 }
 0x1e6   : > { %905 = vst [vmem:[%s545_s11] sm:$0xff] %v904_v31 }
 0x1e7 PF: > { %s2364_s3 = sld [smem:[#allocation24_spill]]  ;;  %s922_s7 = sshll.u32 %s545_s11, 4  ;;  %s923_s7 = int_to_ptr.vmem [resolvable:$true] %s922_s7 }
 0x1e8   : > { %s2365_s19 = sld [smem:[#allocation20_spill]]  ;;  %s1539_s30 = scalar_lea.vmem %s923_s7, 128 }
 0x1e9   : > { %s2366_s26 = sld [smem:[#allocation37_spill]]  ;;  %p1540_p5 = scmp.ne.s32.totalorder %s923_s7, %s1539_s30 }
 0x1ea   : > { %p2368_p9 = scmp.ne.s32.totalorder %s2345_s16, 0  ;;  %s1708_s25 = smov [#allocation13]  }
 0x1eb   : > { %s1543_s12 = sshll.u32 %s1708_s25, 4  ;;  %s1544_s12 = int_to_ptr.vmem [resolvable:$false] %s1543_s12 }
 0x1ec   : > { %p1541_p7 = pnand %p1540_p5, %p2368_p9  ;;  %s1545_s22 = scalar_lea.vmem %s1544_s12, 256 }
 0x1ed   : > { %s1181_s13 = sshll.u32 %s2364_s3, 7  ;;  %p1546_p10 = scmp.lt.s32.totalorder %s923_s7, %s1544_s12 }
 0x1ee   : > { %s2367_s21 = sand.u32 1, %s2365_s19   ;;  %p1542_p11 = pneg %p1541_p7 }
 0x1ef   : > { %s920_s28 = scalar_lea.hbm %s2366_s26, %s1181_s13  ;;  %s907_s1 = scalar_lea.sflag [#allocation6], %s2367_s21 }
 0x1f0   : > { %p1547_p6 = scmp.lt.s32.totalorder %s1545_s22, %s1539_s30 }
 0x1f2   : > { %p1548_p12 = por %p1547_p6, %p1546_p10 }
 0x1f4   : > { %p1549_p3 = pnand %p1548_p12, %p1542_p11 }
 0x1f6   : > { %1552 = shalt.err (!%p1549_p3)
}
 0x1f7   : > { %s1553_s14 = scalar_lea.hbm %s920_s28, 128  ;;  %s1557_s24 = scalar_lea.hbm %s2366_s26, 256 }
 0x1f8   : > { %p1554_p0 = scmp.ne.s32.totalorder %s920_s28, %s1553_s14  ;;  %p1558_p4 = scmp.lt.s32.totalorder %s920_s28, %s2366_s26 }
 0x1f9   : > { %p1559_p2 = scmp.lt.s32.totalorder %s1557_s24, %s1553_s14 }
 0x1fa   : > { %p1555_p8 = pnand %p1554_p0, %p2368_p9 }
 0x1fb   : > { %p1560_p13 = por %p1559_p2, %p1558_p4 }
 0x1fc   : > { %p1556_p1 = pneg %p1555_p8 }
 0x1fe   : > { %p1561_p5 = pnand %p1560_p13, %p1556_p1 }
 0x200   : > { %1564 = shalt.err (!%p1561_p5)
}
 0x201   : > { %1255 = dma.vmem_to_hbm [thread:$0]  (%p2368_p9), %s923_s7, 128, %s920_s28, %s907_s1  }
 0x202 PF: > { %s2369_s4 = sld [smem:[#allocation19_spill]]  ;;  %p1278_p7 = scmp.ge.s32.totalorder %s1695_s18, 2 }
 0x203   : > { %p2370_p11 = scmp.ne.s32.totalorder %s2346_s15, 0 }
 0x205   : > { %p1274_p10 = pnand %p1278_p7, %p2370_p11 }
 0x207   : > { %p1275_p6 = pneg %p1274_p10 }
 0x208   : > { %s934_s3 = sand.u32 1, %s2369_s4  }
 0x209   : > { %s935_s19 = scalar_lea.sflag [#allocation6], %s934_s3 }
 0x20a   : > { %1638 = dma.done.wait (%p1275_p6), %s935_s19, 128  }
 0x20b   : > { %1640 = vsyncadd (%p1275_p6), %s935_s19, 4294967168  ;;  %s30_s18 = sadd.s32 1, %s1695_s18   ;;  %s2372_s27 = sld [smem:[#allocation20_spill]] }
 0x20c   : > { %p2229_p12 = scmp.ge.s32.totalorder %s30_s18, 8   ;;  %s2373_s16 = sld [smem:[#allocation30_spill]] }
 0x20d   : > { %s2374_s11 = sld [smem:[#allocation21_spill]]  ;;  %s2381_s28 = smov %s1651_s29 }
 0x20e   : > { %s2375_s12 = sld [smem:[#allocation22_spill]]  ;;  %s2382_s29 = smov %s1987_s8 }
 0x20f   : > { %s2376_s15 = sld [smem:[#allocation28_spill]]  ;;  %s2383_s30 = smov %s1659_s9 }
 0x210   : > { %s2377_s14 = sld [smem:[#allocation25_spill]]  ;;  %s2384_s9 = smov %s1663_s10 }
 0x211   : > { %s2378_s6 = sld [smem:[#allocation26_spill]] }
 0x212   : > { %s2379_s7 = sld [smem:[#allocation27_spill]]  ;;  %s2385_s10 = smov %s2373_s16 }
 0x214   :  { %29 = sbr.rel (!%p2229_p12) target bundleno = 22 (0x16), region = 162 }
 0x215   : > { %s2386_s13 = smov %s2376_s15  ;;  %s2387_s15 = smov %s1691_s17 }
 0x217   : > { %s2388_s16 = smov %s2378_s6 }
 0x218   : > { %s2389_s17 = smov %s2379_s7 }
 0x219   :  { %940 = vsyncpa [#allocation5], 1 }
 0x21a   :  { %942 = vsyncpa [#allocation5 + $0x1], 1 }
 0x21b   :  { %943 = vsyncpa [#allocation8], 1 }
 0x21c   :  { %945 = vsyncpa [#allocation8 + $0x1], 1 }
 0x21d   :  { %946 = vsyncpa [#allocation11], 1 }
 0x21e   :  { %948 = vsyncpa [#allocation11 + $0x1], 1 }
 0x21f   :  { %949 = vsyncpa [#allocation6], 1 }
 0x220   :  { %951 = vsyncpa [#allocation6 + $0x1], 1 }

</bundles_post_ra>
